<compile_context>
chip_gen: v7x
topology: tpu7x:2x2x1
jax: 0.10.0
libtpu: 0.0.40
codegen_flags: <defaults>
</compile_context>

<pallas_src>
import functools

import numpy as np

import jax
import jax.numpy as jnp
from jax import lax
from jax.experimental import pallas as pl
from jax.experimental.pallas import tpu as pltpu


def _round_up(x, m):
    return ((x + m - 1) // m) * m


# --------------------------------------------------------------------------- #
# Kernel: fused 3x3 / stride-2 / replicate-pad conv  +  BiasFree LayerNorm.
# --------------------------------------------------------------------------- #
def _conv_ln_kernel(xb_ref, w_ref, g_ref, o_ref, *, wp, n_out, inv_cout):
    # xb_ref: (4*Cin, L)   polyphase slab; sublane row = cin*4 + phase,
    #                      lane l = local_out_row * wp + out_col  (wp = Wo + 1)
    # w_ref : (4, Cout, 4*Cin)  shift-grouped conv taps (zero-padded)
    # g_ref : (Cout, 1)    LayerNorm gamma (f32)
    # o_ref : (Cout, n_out) output tile; lane axis matches xb's flattening
    acc = None
    for i, shift in enumerate((0, 1, wp, wp + 1)):
        rhs = xb_ref[:, shift:shift + n_out]                     # (4*Cin, n_out)
        part = jnp.dot(w_ref[i], rhs, preferred_element_type=jnp.float32)
        acc = part if acc is None else acc + part

    # BiasFree LayerNorm over the channel axis (axis 0):
    #   out = y * rsqrt(var + 1e-5) * gamma   (centered two-pass variance)
    mu = jnp.sum(acc, axis=0, keepdims=True) * inv_cout
    delta = acc - mu
    var = jnp.sum(delta * delta, axis=0, keepdims=True) * inv_cout
    o_ref[...] = (acc * lax.rsqrt(var + 1e-5) * g_ref[...]).astype(o_ref.dtype)


# --------------------------------------------------------------------------- #
# Host-side helpers (all static / numpy).
# --------------------------------------------------------------------------- #
def _pick_row_tile(ho, wo, cin, cout, batch, c_bytes, o_bytes, vmem_budget_bytes):
    """Largest output-row tile under the VMEM budget; capped so a B==1 launch
    still has >=2 grid steps (both v7x TensorCores engaged)."""
    wp = wo + 1
    per_row = (4 * cin * wp * c_bytes) * 2           # input slab, double-buffered
    per_row += cout * wp * (2 * o_bytes + 3 * 4)     # out tile (x2) + f32 temps
    tr = max(1, int(vmem_budget_bytes) // max(per_row, 1))
    tr = min(tr, ho)
    if batch == 1 and ho >= 2:
        tr = min(tr, -(-ho // 2))
    return int(tr)


def _gather_indices(H, W, wo, tr, nrb, n_out):
    """Static flat indices into x[..., H*W] building the per-row-block
    polyphase slabs (replicate padding == index clamping)."""
    wp = wo + 1
    L = _round_up(n_out + wp + 1, 128)       # widest in-kernel shift is wp + 1
    lane = np.arange(L, dtype=np.int64)
    t = lane // wp                            # local output row
    w = lane % wp                             # output col (w == wo is junk)
    blk = np.arange(nrb, dtype=np.int64)[:, None]
    idx = np.empty((4, nrb, L), np.int32)
    for r in range(4):
        rp, cp = r // 2, r % 2                # row / col parity of this phase
        rows = np.clip(2 * (blk * tr + t[None, :]) + rp - 1, 0, H - 1)
        cols = np.clip(2 * w + cp - 1, 0, W - 1)
        idx[r] = rows * W + cols[None, :]
    return idx.reshape(-1), L


# --------------------------------------------------------------------------- #
# Forward wrapper.
# --------------------------------------------------------------------------- #
@functools.partial(jax.jit,
                   static_argnames=("compute_dtype", "out_dtype",
                                    "vmem_budget_bytes"))
def extractor_forward(x, conv_w, ln_gamma, *, compute_dtype=jnp.bfloat16,
                      out_dtype=None, vmem_budget_bytes=16 * 1024 * 1024):
    """x: (B, C_in, H, W) NCHW; conv_w: (C_out, C_in, 3, 3); ln_gamma: (C_out,)."""
    B, Cin, H, W = x.shape
    Cout = conv_w.shape[0]
    ho, wo = (H + 1) // 2, (W + 1) // 2          # k=3, stride=2, pad=1
    wp = wo + 1                                  # lane row-stride (1 junk col/row)
    if out_dtype is None:
        out_dtype = compute_dtype
    c_bytes = jnp.dtype(compute_dtype).itemsize
    o_bytes = jnp.dtype(out_dtype).itemsize

    tr = _pick_row_tile(ho, wo, Cin, Cout, B, c_bytes, o_bytes, vmem_budget_bytes)
    nrb = -(-ho // tr)                           # number of row blocks
    n_l = tr * wp
    n_out = _round_up(n_l, 128)                  # lane-dense output tile width

    # One gather pass over x (the only HBM intermediate, ~1.05x the input in
    # the compute dtype).  The reshape below is a pure metadata regrouping:
    # row = cin*4 + phase, lane = row_block*L + flat_pixel.
    idx, L = _gather_indices(H, W, wo, tr, nrb, n_out)
    xg = jnp.take(x.reshape(B, Cin, H * W), jnp.asarray(idx), axis=2)
    xg = xg.reshape(B, 4 * Cin, nrb * L).astype(compute_dtype)

    # Shift-grouped weights: one (Cout, 4*Cin) matrix per lane shift
    # {0, 1, wp, wp+1}; taps outside the 3x3 window are zero.
    zero = jnp.zeros((Cout, Cin), conv_w.dtype)
    groups = []
    for a in (0, 1):              # extra output-row offset (kh // 2)
        for bb in (0, 1):         # extra output-col offset (kw // 2)
            cols = []
            for r in range(4):
                kh, kw = 2 * a + r // 2, 2 * bb + r % 2
                cols.append(conv_w[:, :, kh, kw] if (kh < 3 and kw < 3) else zero)
            groups.append(jnp.stack(cols, axis=-1))          # (Cout, Cin, 4)
    w4 = jnp.stack(groups, axis=0).reshape(4, Cout, 4 * Cin).astype(compute_dtype)
    gamma = ln_gamma.reshape(Cout, 1).astype(jnp.float32)

    kernel = functools.partial(_conv_ln_kernel, wp=wp, n_out=n_out,
                               inv_cout=1.0 / Cout)
    out_flat = pl.pallas_call(
        kernel,
        out_shape=jax.ShapeDtypeStruct((B, Cout, nrb * n_out), out_dtype),
        grid_spec=pltpu.PrefetchScalarGridSpec(
            num_scalar_prefetch=0,
            grid=(B, nrb),
            in_specs=[
                pl.BlockSpec((None, 4 * Cin, L), lambda b, j: (b, 0, j)),
                pl.BlockSpec((4, Cout, 4 * Cin), lambda b, j: (0, 0, 0)),
                pl.BlockSpec((Cout, 1), lambda b, j: (0, 0)),
            ],
            out_specs=pl.BlockSpec((None, Cout, n_out), lambda b, j: (b, 0, j)),
        ),
        compiler_params=pltpu.CompilerParams(
            dimension_semantics=("parallel", "parallel"),
            vmem_limit_bytes=48 * 1024 * 1024),
    )(xg, w4, gamma)

    # Strip rounding tail, per-row junk column and ragged rows (cheap XLA slice).
    y = out_flat.reshape(B, Cout, nrb, n_out)[:, :, :, :n_l]
    y = y.reshape(B, Cout, nrb * tr, wp)[:, :, :ho, :wo]
    return y


# --------------------------------------------------------------------------- #
# Pure-JAX reference replicating the PyTorch forward exactly (f32).
# --------------------------------------------------------------------------- #
def extractor_reference(x, conv_w, ln_gamma):
    xp = jnp.pad(x, ((0, 0), (0, 0), (1, 1), (1, 1)), mode="edge")
    y = lax.conv_general_dilated(
        xp, conv_w, window_strides=(2, 2), padding="VALID",
        dimension_numbers=("NCHW", "OIHW", "NCHW"),
        precision=lax.Precision.HIGHEST)
    t = jnp.transpose(y, (0, 2, 3, 1))                 # (B, Ho, Wo, C_out)
    var = jnp.var(t, axis=-1, keepdims=True)           # biased variance
    t = t / jnp.sqrt(var + 1e-5) * ln_gamma
    return jnp.transpose(t, (0, 3, 1, 2))


if __name__ == "__main__":
    def run_case(key, B, Cin, Cout, H, W):
        kx, kw = jax.random.split(key)
        x = jax.random.normal(kx, (B, Cin, H, W), dtype=jnp.float32)
        conv_w = jax.random.normal(kw, (Cout, Cin, 3, 3), dtype=jnp.float32) * 0.1
        gamma = jnp.ones((Cout,), dtype=jnp.float32)   # BiasFree LayerNorm weight
        ho, wo = (H + 1) // 2, (W + 1) // 2

        ref = jax.block_until_ready(extractor_reference(x, conv_w, gamma))

        # Exact path (f32 matmul inputs + f32 output).
        out32 = jax.block_until_ready(
            extractor_forward(x, conv_w, gamma, compute_dtype=jnp.float32,
                              out_dtype=jnp.float32))
        assert out32.shape == (B, Cout, ho, wo), out32.shape
        assert jnp.allclose(out32, ref, rtol=1e-4, atol=1e-4), \
            float(jnp.abs(out32 - ref).max())

        # Default path (bf16 matmul inputs, f32 accumulation/LN, bf16 output).
        out16 = jax.block_until_ready(extractor_forward(x, conv_w, gamma))
        assert out16.shape == (B, Cout, ho, wo), out16.shape
        out16 = out16.astype(jnp.float32)
        assert jnp.allclose(out16, ref, rtol=1e-1, atol=1e-1), \
            float(jnp.abs(out16 - ref).max())

    key = jax.random.PRNGKey(0)
    k1, k2 = jax.random.split(key)
    # Extractor(n_features_in=4, n_features_out=8, ...): only cnn_layer is used
    # by forward().  Case 1: even spatial dims, single row block per batch.
    run_case(k1, B=2, Cin=4, Cout=8, H=16, W=16)
    # Case 2: odd H, non-dividing row tile (ragged last block), B == 1
    # (exercises the megacore row split and the index-clamped replicate pad).
    run_case(k2, B=1, Cin=4, Cout=8, H=45, W=38)

    print("KERNEL_OK")
</pallas_src>

<mosaic_0001>
module attributes {stable_mosaic.version = 11 : i64} {
  func.func @_conv_ln_kernel(%arg0: i32, %arg1: i32, %arg2: memref<1x16x256xf32, #tpu.memory_space<vmem>>, %arg3: memref<4x8x16xf32, #tpu.memory_space<vmem>>, %arg4: memref<8x1xf32, #tpu.memory_space<vmem>>, %arg5: memref<1x8x128xf32, #tpu.memory_space<vmem>>) attributes {dimension_semantics = [#tpu.dimension_semantics<parallel>, #tpu.dimension_semantics<parallel>], iteration_bounds = array<i64: 2, 1>, scalar_prefetch = 0 : i64, scratch_operands = 0 : i64, tpu.core_type = #tpu.core_type<tc>, window_params = [{transform_indices = @transform_0, window_bounds = array<i64: 1, 16, 256>}, {pipeline_mode = #tpu.pipeline_mode<synchronous>, transform_indices = @transform_1, window_bounds = array<i64: 4, 8, 16>}, {pipeline_mode = #tpu.pipeline_mode<synchronous>, transform_indices = @transform_2, window_bounds = array<i64: 8, 1>}, {transform_indices = @transform_3, window_bounds = array<i64: 1, 8, 128>}]} {
    %c0 = arith.constant 0 : index
    %c0_0 = arith.constant 0 : index
    %c0_1 = arith.constant 0 : index
    %0 = vector.load %arg2[%c0, %c0_0, %c0_1] : memref<1x16x256xf32, #tpu.memory_space<vmem>>, vector<1x16x128xf32>
    %1 = vector.shape_cast %0 : vector<1x16x128xf32> to vector<16x128xf32>
    %c0_2 = arith.constant 0 : index
    %c0_3 = arith.constant 0 : index
    %c0_4 = arith.constant 0 : index
    %2 = vector.load %arg3[%c0_2, %c0_3, %c0_4] : memref<4x8x16xf32, #tpu.memory_space<vmem>>, vector<1x8x16xf32>
    %3 = vector.shape_cast %2 : vector<1x8x16xf32> to vector<8x16xf32>
    %cst = arith.constant dense<0.000000e+00> : vector<8x128xf32>
    %4 = tpu.matmul %3, %1, %cst {dimension_numbers = #tpu.dot_dimension_numbers<[1], [0], [0], [1], [0, 0, 1, 1], [], []>} : vector<8x16xf32>, vector<16x128xf32>, vector<8x128xf32> -> vector<8x128xf32>
    %c0_5 = arith.constant 0 : index
    %c0_6 = arith.constant 0 : index
    %c1 = arith.constant 1 : index
    %5 = vector.load %arg2[%c0_5, %c0_6, %c1] : memref<1x16x256xf32, #tpu.memory_space<vmem>>, vector<1x16x128xf32>
    %6 = vector.shape_cast %5 : vector<1x16x128xf32> to vector<16x128xf32>
    %c1_7 = arith.constant 1 : index
    %c0_8 = arith.constant 0 : index
    %c0_9 = arith.constant 0 : index
    %7 = vector.load %arg3[%c1_7, %c0_8, %c0_9] : memref<4x8x16xf32, #tpu.memory_space<vmem>>, vector<1x8x16xf32>
    %8 = vector.shape_cast %7 : vector<1x8x16xf32> to vector<8x16xf32>
    %cst_10 = arith.constant dense<0.000000e+00> : vector<8x128xf32>
    %9 = tpu.matmul %8, %6, %cst_10 {dimension_numbers = #tpu.dot_dimension_numbers<[1], [0], [0], [1], [0, 0, 1, 1], [], []>} : vector<8x16xf32>, vector<16x128xf32>, vector<8x128xf32> -> vector<8x128xf32>
    %10 = arith.addf %4, %9 : vector<8x128xf32>
    %c0_11 = arith.constant 0 : index
    %c0_12 = arith.constant 0 : index
    %c9 = arith.constant 9 : index
    %11 = vector.load %arg2[%c0_11, %c0_12, %c9] : memref<1x16x256xf32, #tpu.memory_space<vmem>>, vector<1x16x128xf32>
    %12 = vector.shape_cast %11 : vector<1x16x128xf32> to vector<16x128xf32>
    %c2 = arith.constant 2 : index
    %c0_13 = arith.constant 0 : index
    %c0_14 = arith.constant 0 : index
    %13 = vector.load %arg3[%c2, %c0_13, %c0_14] : memref<4x8x16xf32, #tpu.memory_space<vmem>>, vector<1x8x16xf32>
    %14 = vector.shape_cast %13 : vector<1x8x16xf32> to vector<8x16xf32>
    %cst_15 = arith.constant dense<0.000000e+00> : vector<8x128xf32>
    %15 = tpu.matmul %14, %12, %cst_15 {dimension_numbers = #tpu.dot_dimension_numbers<[1], [0], [0], [1], [0, 0, 1, 1], [], []>} : vector<8x16xf32>, vector<16x128xf32>, vector<8x128xf32> -> vector<8x128xf32>
    %16 = arith.addf %10, %15 : vector<8x128xf32>
    %c0_16 = arith.constant 0 : index
    %c0_17 = arith.constant 0 : index
    %c10 = arith.constant 10 : index
    %17 = vector.load %arg2[%c0_16, %c0_17, %c10] : memref<1x16x256xf32, #tpu.memory_space<vmem>>, vector<1x16x128xf32>
    %18 = vector.shape_cast %17 : vector<1x16x128xf32> to vector<16x128xf32>
    %c3 = arith.constant 3 : index
    %c0_18 = arith.constant 0 : index
    %c0_19 = arith.constant 0 : index
    %19 = vector.load %arg3[%c3, %c0_18, %c0_19] : memref<4x8x16xf32, #tpu.memory_space<vmem>>, vector<1x8x16xf32>
    %20 = vector.shape_cast %19 : vector<1x8x16xf32> to vector<8x16xf32>
    %cst_20 = arith.constant dense<0.000000e+00> : vector<8x128xf32>
    %21 = tpu.matmul %20, %18, %cst_20 {dimension_numbers = #tpu.dot_dimension_numbers<[1], [0], [0], [1], [0, 0, 1, 1], [], []>} : vector<8x16xf32>, vector<16x128xf32>, vector<8x128xf32> -> vector<8x128xf32>
    %22 = arith.addf %16, %21 : vector<8x128xf32>
    %cst_21 = arith.constant dense<0.000000e+00> : vector<128xf32>
    %23 = vector.multi_reduction <add>, %22, %cst_21 [0] : vector<8x128xf32> to vector<128xf32>
    %24 = vector.shape_cast %23 : vector<128xf32> to vector<1x128xf32>
    %cst_22 = arith.constant 1.250000e-01 : f32
    %25 = vector.broadcast %cst_22 : f32 to vector<1x128xf32>
    %26 = arith.mulf %24, %25 : vector<1x128xf32>
    %27 = vector.broadcast %26 : vector<1x128xf32> to vector<8x128xf32>
    %28 = arith.subf %22, %27 : vector<8x128xf32>
    %29 = arith.mulf %28, %28 : vector<8x128xf32>
    %cst_23 = arith.constant dense<0.000000e+00> : vector<128xf32>
    %30 = vector.multi_reduction <add>, %29, %cst_23 [0] : vector<8x128xf32> to vector<128xf32>
    %31 = vector.shape_cast %30 : vector<128xf32> to vector<1x128xf32>
    %cst_24 = arith.constant 1.250000e-01 : f32
    %32 = vector.broadcast %cst_24 : f32 to vector<1x128xf32>
    %33 = arith.mulf %31, %32 : vector<1x128xf32>
    %cst_25 = arith.constant 9.99999974E-6 : f32
    %34 = vector.broadcast %cst_25 : f32 to vector<1x128xf32>
    %35 = arith.addf %33, %34 : vector<1x128xf32>
    %36 = math.rsqrt %35 : vector<1x128xf32>
    %37 = vector.broadcast %36 : vector<1x128xf32> to vector<8x128xf32>
    %38 = arith.mulf %22, %37 : vector<8x128xf32>
    %c0_26 = arith.constant 0 : index
    %c0_27 = arith.constant 0 : index
    %39 = vector.load %arg4[%c0_26, %c0_27] : memref<8x1xf32, #tpu.memory_space<vmem>>, vector<8x1xf32>
    %40 = vector.broadcast %39 : vector<8x1xf32> to vector<8x128xf32>
    %41 = arith.mulf %38, %40 : vector<8x128xf32>
    %c0_28 = arith.constant 0 : index
    %c0_29 = arith.constant 0 : index
    %c0_30 = arith.constant 0 : index
    %42 = vector.load %arg5[%c0_28, %c0_29, %c0_30] : memref<1x8x128xf32, #tpu.memory_space<vmem>>, vector<1x8x128xf32>
    %43 = vector.shape_cast %42 : vector<1x8x128xf32> to vector<8x128xf32>
    %44 = vector.shape_cast %41 : vector<8x128xf32> to vector<1x8x128xf32>
    tpu.vector_store %arg5[%c0_28, %c0_29, %c0_30], %44 {strides = array<i32>} : memref<1x8x128xf32, #tpu.memory_space<vmem>>, vector<1x8x128xf32>,
    return
  }
  func.func @transform_0(%arg0: i32, %arg1: i32) -> (i32, i32, i32) {
    %c0_i32 = arith.constant 0 : i32
    %c0_i32_0 = arith.constant 0 : i32
    return %arg0, %c0_i32, %arg1 : i32, i32, i32
  }
  func.func @transform_1(%arg0: i32, %arg1: i32) -> (i32, i32, i32) {
    %c0_i32 = arith.constant 0 : i32
    %c0_i32_0 = arith.constant 0 : i32
    %c0_i32_1 = arith.constant 0 : i32
    %c0_i32_2 = arith.constant 0 : i32
    return %c0_i32, %c0_i32_0, %c0_i32_1 : i32, i32, i32
  }
  func.func @transform_2(%arg0: i32, %arg1: i32) -> (i32, i32) {
    %c0_i32 = arith.constant 0 : i32
    %c0_i32_0 = arith.constant 0 : i32
    %c0_i32_1 = arith.constant 0 : i32
    return %c0_i32, %c0_i32_0 : i32, i32
  }
  func.func @transform_3(%arg0: i32, %arg1: i32) -> (i32, i32, i32) {
    %c0_i32 = arith.constant 0 : i32
    %c0_i32_0 = arith.constant 0 : i32
    return %arg0, %c0_i32, %arg1 : i32, i32, i32
  }
}

</mosaic_0001>

<bundles_post_ra>
// kernel: extractor_forward.1
= control target key start
LH: loop header
LB: loop body
LE: loop exit
PB: predicated region body
PF: predicated region fallthrough
CT: control target
= control target key end

     0   :  { %s850_s12 = smov 0   ;;  %s852_s13 = smov 0   ;;  %s918_s0 = inlined_call_operand.vmem [shape: f32[2,16,256], index: 0, kind: input, shape index: {}]   ;;  %s919_s1 = inlined_call_operand.vmem [shape: f32[4,8,16], index: 1, kind: input, shape index: {}]   ;;  %s920_s2 = inlined_call_operand.vmem [shape: f32[8,1], index: 2, kind: input, shape index: {}]   ;;  %s921_s3 = inlined_call_operand.vmem [shape: f32[2,8,128], index: 3, kind: output, shape index: {}]  }
   0x1   :  { %s854_s14 = smov 0  }
   0x2 LB: > { %s25_s15 = sadd.s32 1, %s817_s13  ;;  %p664_p0 = scmp.ge.s32.totalorder %s821_s14, 1  ;;  %s821_s14 = sphi %s854_s14, %s13_s14   ;;  %s817_s13 = sphi %s852_s13, %s923_s13   ;;  %s813_s12 = sphi %s850_s12, %s922_s12  }
   0x3   : > { %p27_p1 = scmp.ge.s32.totalorder %s25_s15, 2  ;;  %p158_p2 = scmp.lt.s32.totalorder %s821_s14, 3 }
   0x5   : > { %s925_s15 = smov (%p27_p1, %s25_s15), 0  ;;  %p159_p3 = pnand %p664_p0, %p158_p2 }
   0x6   : > { %p189_p4 = scmp.lt.s32.totalorder (!%p159_p3), %s813_s12, 1  ;;  %v823_v0 = vmov (!%p159_p3), 0.0|0.0   ;;  %vm824_vm0 = vmmov (!%p159_p3), 0   ;;  %v825_v6 = vmov (!%p159_p3), 0.0   ;;  %s826_s20 = smov (!%p159_p3), 119   ;;  %v829_v9 = vmov (!%p159_p3), 0  }
   0x7   : > { %162 = sbr.rel (%p159_p3) target bundleno = 419 (0x1a3), region = 32  ;;  %718 = vmatprep.subr.bf16.mxu1 (!%p159_p3), %v823_v0  ;;  %724 = vmatprep.subr.bf16.mxu0 (!%p159_p3), %v823_v0  ;;  %s827_s21 = smov (!%p159_p3), 127   ;;  %v575_v10 = vld [vmem:[%s920_s2] sm:$0xff] (!%p159_p3)  ;;  %vm226_vm1 = vcmask (!%p159_p3), 1039360   ;;  %vm388_vm2 = vcmask (!%p159_p3), 973824   ;;  %vm477_vm3 = vcmask (!%p159_p3), 965632  }
   0x8   : > { %694 = vmatprep.mubr.msk.f32.mxu1 (!%p159_p3), %vm824_vm0, %v825_v6  ;;  %708 = vmatprep.mubr.msk.f32.mxu0 (!%p159_p3), %vm824_vm0, %v825_v6  ;;  %s828_s22 = smov (!%p159_p3), 118   ;;  %v668_v35 = vld [vmem:[%s919_s1 + $0x8] sm:$0xff] (!%p159_p3)  ;;  %vm231_vm4 = vcmask (!%p159_p3), 130048   ;;  %v671_v36 = vld [vmem:[%s919_s1 + $0x10] sm:$0xff] (!%p159_p3)  ;;  %v207_v40 = vld [vmem:[%s919_s1] sm:$0xff] (!%p159_p3) }
   0x9   : > { %796 = vset.pattern.permute.xlu0 (!%p159_p3), %v829_v9  ;;  %v673_v41 = vld [vmem:[%s919_s1 + $0x18] sm:$0xff] (!%p159_p3) }
   0xe   : > { %s927_s12 = smov (!%p189_p4, %s813_s12), 1 }
   0xf   : > { %s677_s16 = sshll.u32 %s927_s12, 5  ;;  %s667_s6 = sshll.u32 %s927_s12, 3 }
  0x10   : > { %s196_s19 = scalar_lea.vmem %s918_s0, %s677_s16  ;;  %s204_s9 = scalar_lea.vmem %s921_s3, %s667_s6 }
  0x11   : > { %v876_v1 = vld [vmem:[%s196_s19] sm:$0xff]  ;;  %v209_v2 = vld [vmem:[%s196_s19 + $0x8] sm:$0xff]  ;;  %v210_v3 = vld [vmem:[%s196_s19 + $0x10] sm:$0xff] }
  0x12   : > { %v776_v4 = vpack.i.bf16 %v209_v2, %v876_v1  ;;  %v211_v5 = vld [vmem:[%s196_s19 + $0x18] sm:$0xff]  ;;  %v722_v7 = vpack.c.bf16 %v210_v3, %v876_v1 }
  0x13   : > { %v781_v8 = vpack.i.bf16 %v211_v5, %v210_v3 }
  0x14   : > { %777 = vrot.lane.b32.xlu1 %v776_v4, %s826_s20  ;;  %767 = vrot.lane.b32.xlu0 %v776_v4, %s827_s21 }
  0x18   : > { %782 = vrot.lane.b32.xlu1 %v781_v8, %s826_s20  ;;  %772 = vrot.lane.b32.xlu0 %v781_v8, %s827_s21 }
  0x1c   : > { %792 = vrot.lane.b32.xlu1 %v781_v8, %s828_s22  ;;  %787 = vrot.lane.b32.xlu0 %v776_v4, %s828_s22 }
  0x20   : > { %578 = vperm.xlu0 %796, %v575_v10  }
  0x86   : > { %v778_v11 = vpop.permute.xlu1 %777  ;;  %v768_v12 = vpop.permute.xlu0 %767 }
  0x87   : > { %v780_v13 = vunpack.i.h.bf16 %v778_v11  ;;  %v779_v14 = vunpack.i.l.bf16 %v778_v11  ;;  %v770_v15 = vunpack.i.h.bf16 %v768_v12  ;;  %v769_v16 = vunpack.i.l.bf16 %v768_v12 }
  0x89   : > { %v227_v23 = vsel %vm226_vm1, %v769_v16, %v770_v15  ;;  %v389_v25 = vsel %vm388_vm2, %v779_v14, %v780_v13 }
  0x8a   : > { %v783_v17 = vpop.permute.xlu1 %782  ;;  %v773_v18 = vpop.permute.xlu0 %772 }
  0x8b   : > { %v785_v19 = vunpack.i.h.bf16 %v783_v17  ;;  %v784_v20 = vunpack.i.l.bf16 %v783_v17  ;;  %v775_v21 = vunpack.i.h.bf16 %v773_v18  ;;  %v774_v22 = vunpack.i.l.bf16 %v773_v18 }
  0x8d   : > { %v228_v24 = vsel %vm226_vm1, %v774_v22, %v775_v21  ;;  %v390_v26 = vsel %vm388_vm2, %v784_v20, %v785_v19 }
  0x8e   : > { %v793_v27 = vpop.permute.xlu1 %792  ;;  %v788_v28 = vpop.permute.xlu0 %787  ;;  %v719_v29 = vpack.c.bf16 %v228_v24, %v227_v23  ;;  %v725_v30 = vpack.c.bf16 %v390_v26, %v389_v25 }
  0x8f   : > { %v795_v31 = vunpack.i.h.bf16 %v793_v27  ;;  %v794_v32 = vunpack.i.l.bf16 %v793_v27  ;;  %v790_v33 = vunpack.i.h.bf16 %v788_v28  ;;  %v789_v34 = vunpack.i.l.bf16 %v788_v28 }
  0x90   : > { %720 = vmatpush3.bf16.msra.mxu1 %v719_v29  ;;  %726 = vmatpush3.bf16.msra.mxu0 %v725_v30 }
  0x91   : > { %v479_v37 = vsel %vm477_vm3, %v794_v32, %v795_v31  ;;  %v478_v38 = vsel %vm477_vm3, %v789_v34, %v790_v33  ;;  %721 = vmatprep.subr.bf16.mxu1 %v823_v0  ;;  %727 = vmatprep.subr.bf16.mxu0 %v823_v0 }
  0x92   : > { %v728_v39 = vpack.c.bf16 %v479_v37, %v478_v38 }
  0x93   : > { %695 = vmatmul.mubr.msk.f32.vlgmr.msra.gmra.mrb[0].mxu1 %vm231_vm4, %v668_v35  ;;  %709 = vmatmul.mubr.msk.f32.vlgmr.msra.gmra.mrb[0].mxu0 %vm231_vm4, %v671_v36 }
  0x94   : > { %723 = vmatpush3.bf16.msra.mxu1 %v722_v7  ;;  %729 = vmatpush3.bf16.msra.mxu0 %v728_v39 }
  0x95   : > { %701 = vmatprep.mubr.msk.f32.mxu1 %vm824_vm0, %v825_v6  ;;  %715 = vmatprep.mubr.msk.f32.mxu0 %vm824_vm0, %v825_v6 }
  0x9b   : > { %702 = vmatmul.mubr.msk.f32.vlgmr.msra.gmra.mrb[0].mxu1 %vm231_vm4, %v207_v40  ;;  %716 = vmatmul.mubr.msk.f32.vlgmr.msra.gmra.mrb[0].mxu0 %vm231_vm4, %v673_v41 }
  0x9f   : > { %v579_v1 = vpop.permute.xlu0 %578 }
 0x16e   : > { %v374_v42 = vpop.f32.mrb[0].mxu1  ;;  %v551_v43 = vpop.f32.mrb[0].mxu0 }
 0x16f   : > { %v730_v44 = vadd.f32 %v551_v43, %v374_v42  ;;  %v703_v45 = vpop.f32.mrb[1].mxu1  ;;  %v717_v46 = vpop.f32.mrb[1].mxu0 }
 0x171   : > { %v556_v47 = vrot.slane %v730_v44, 4 }
 0x173   : > { %v557_v48 = vadd.f32 %v730_v44, %v556_v47 }
 0x175   : > { %v558_v49 = vrot.slane %v557_v48, 2 }
 0x177   : > { %v559_v50 = vadd.f32 %v558_v49, %v557_v48 }
 0x179   : > { %v560_v51 = vrot.slane %v559_v50, 1 }
 0x17b   : > { %v561_v52 = vadd.f32 %v560_v51, %v559_v50 }
 0x17d   : > { %v562_v53 = vmul.f32 0.125, %v561_v52 }
 0x17f   : > { %v563_v54 = vsub.f32 %v730_v44, %v562_v53 }
 0x181   : > { %v564_v55 = vmul.f32 %v563_v54, %v563_v54 }
 0x183   : > { %v565_v56 = vrot.slane %v564_v55, 4 }
 0x185   : > { %v566_v57 = vadd.f32 %v565_v56, %v564_v55 }
 0x187   : > { %v567_v58 = vrot.slane %v566_v57, 2 }
 0x189   : > { %v568_v59 = vadd.f32 %v567_v58, %v566_v57 }
 0x18b   : > { %v569_v60 = vrot.slane %v568_v59, 1 }
 0x18d   : > { %v570_v61 = vadd.f32 %v569_v60, %v568_v59 }
 0x18f   : > { %v571_v62 = vmul.f32 0.125, %v570_v61 }
 0x191   : > { %v572_v63 = vadd.f32 1e-05, %v571_v62 }
 0x193   : > { %797 = vrsqrt.f32 %v572_v63 }
 0x19d   : > { %v798_v0 = vpop.eup %797 }
 0x19e   : > { %v574_v2 = vmul.f32 %v798_v0, %v730_v44 }
 0x1a0   : > { %v581_v3 = vmul.f32 %v579_v1, %v574_v2 }
 0x1a2   : > { %582 = vst [vmem:[%s204_s9] sm:$0xff] %v581_v3 }
 0x1a3 PF: > { %s13_s14 = sadd.s32 1, %s821_s14   ;;  %s922_s12 = smov %s817_s13 }
 0x1a4   : > { %p10_p5 = scmp.ge.s32.totalorder %s13_s14, 4   ;;  %s923_s13 = smov %s925_s15 }
 0x1a6   :  { %12 = sbr.rel (!%p10_p5) target bundleno = 2 (0x2), region = 65 }

</bundles_post_ra>
